<compile_context>
chip_gen: v7x
topology: tpu7x:2x2x1
jax: 0.10.0
libtpu: 0.0.40
codegen_flags: <defaults>
</compile_context>

<pallas_src>
import functools

import jax
import jax.numpy as jnp
import numpy as np
from jax.experimental import pallas as pl
from jax.experimental.pallas import tpu as pltpu


# ---------------------------------------------------------------------------
# Kernel: complex channel contraction, elementwise over the folded mode axis.
# ---------------------------------------------------------------------------
def _spectral_mul_kernel(xr_ref, xi_ref, wr_ref, wi_ref, or_ref, oi_ref, *,
                         unroll):
    """out[b,o,m] = sum_i x[b,i,m] * w[i,o,m]   (complex, per-mode weights).

    xr/xi : (Cin, B,   TM)  real / imag of the truncated spectrum
    wr/wi : (Cin, TCO, TM)  real / imag of the weights (only 2 weight streams)
    or/oi : (B,   TCO, TM)
    Per-mode weights make the channel contraction elementwise in m, so this is
    a VPU kernel (MXU not applicable).
    """
    cin = xr_ref.shape[0]

    def body(i, carry):
        acc_r, acc_i = carry
        xr = xr_ref[i][:, None, :]        # (B, 1, TM)
        xi = xi_ref[i][:, None, :]
        wr = wr_ref[i][None, :, :]        # (1, TCO, TM)
        wi = wi_ref[i][None, :, :]
        # Plain 4-mul complex multiply: cheaper on HBM than Karatsuba's 3
        # weight streams; the extra VALU op hides under weight DMA.
        acc_r = acc_r + xr * wr - xi * wi
        acc_i = acc_i + xr * wi + xi * wr
        return acc_r, acc_i

    acc_r = jnp.zeros(or_ref.shape, jnp.float32)
    acc_i = jnp.zeros(oi_ref.shape, jnp.float32)

    if cin <= 8:
        # Small channel count: static unroll (full LLO scheduling visibility).
        for i in range(cin):
            acc_r, acc_i = body(i, (acc_r, acc_i))
    else:
        # Bounded unroll: keeps vreg live ranges in check for big tiles.
        acc_r, acc_i = jax.lax.fori_loop(0, cin, body, (acc_r, acc_i),
                                         unroll=unroll)

    or_ref[...] = acc_r
    oi_ref[...] = acc_i


# ---------------------------------------------------------------------------
# Tile selection helpers (VMEM- and vreg-aware).
# ---------------------------------------------------------------------------
def _vmem_capacity_bytes():
    try:
        info = pltpu.get_tpu_info()
        cap = getattr(info, "vmem_capacity_bytes", None)
        if cap:
            return int(cap)
    except Exception:
        pass
    return 64 * 1024 * 1024  # conservative (v7x per-TC VMEM)


def _divisor_tiles(n, step):
    """Divisors of n that are multiples of `step`, descending; fallback [n]."""
    cands = [d for d in range(step, n + 1, step) if n % d == 0]
    cands.sort(reverse=True)
    return cands if cands else [n]


def _choose_tiles(B, Cin, Cout, Mpad, vmem_budget):
    tm_cands = _divisor_tiles(Mpad, 128)
    tco_cands = [Cout] if Cout <= 8 else _divisor_tiles(Cout, 8)

    def block_bytes(tm, tco):
        x_b = 2 * Cin * B * tm * 4        # xr + xi blocks
        w_b = 2 * Cin * tco * tm * 4      # wr + wi blocks
        o_b = 2 * B * tco * tm * 4        # or + oi blocks
        return 2 * (x_b + w_b + o_b)      # double-buffered

    # Keep both accumulators comfortably inside the 64x4KiB vreg file.
    vreg_cap_elems = 8192                 # per-accumulator f32 elements

    # Shrink TM first, then TCO (per review), honoring both budgets.
    for tco in tco_cands:
        for tm in tm_cands:
            if (block_bytes(tm, tco) <= vmem_budget
                    and B * tco * tm <= vreg_cap_elems):
                return tm, tco
    # Relax the vreg cap (compiler spills accumulators explicitly).
    for tco in tco_cands:
        for tm in tm_cands:
            if block_bytes(tm, tco) <= vmem_budget:
                return tm, tco
    return tm_cands[-1], tco_cands[-1]


def _ensure_parallel_split(tm, tco, Mpad, Cout):
    """Guarantee >= 2 grid steps along a parallel axis (v7x 2-TC sharding)."""
    if Mpad // tm >= 2 or Cout // tco >= 2:
        return tm, tco
    for cand in _divisor_tiles(Mpad, 128):
        if cand < tm:
            return cand, tco
    if Cout > 8:
        for cand in _divisor_tiles(Cout, 8):
            if cand < tco:
                return tm, cand
    return tm, tco


# ---------------------------------------------------------------------------
# pallas_call wrapper.
# ---------------------------------------------------------------------------
def _spectral_mul(x_r, x_i, w_r, w_i, B, Cin, Cout, Mpad):
    vmem_cap = _vmem_capacity_bytes()
    vmem_budget = int(vmem_cap * 0.55)

    tm, tco = _choose_tiles(B, Cin, Cout, Mpad, vmem_budget)
    tm, tco = _ensure_parallel_split(tm, tco, Mpad, Cout)

    n_mi = Mpad // tm
    n_co = Cout // tco
    unroll = 8 if tco * tm <= 8192 else (4 if tco * tm <= 32768 else 2)

    # Mode tiles outermost, Cout tiles innermost (fastest): the x block index
    # depends only on mi, so it is constant across consecutive co steps and
    # Pallas skips its re-DMA.  Both axes are embarrassingly parallel.
    grid = (n_mi, n_co)
    x_spec = pl.BlockSpec((Cin, B, tm), lambda mi, co: (0, 0, mi))
    w_spec = pl.BlockSpec((Cin, tco, tm), lambda mi, co: (0, co, mi))
    o_spec = pl.BlockSpec((B, tco, tm), lambda mi, co: (0, co, mi))

    out_shape = (
        jax.ShapeDtypeStruct((B, Cout, Mpad), jnp.float32),
        jax.ShapeDtypeStruct((B, Cout, Mpad), jnp.float32),
    )

    kernel = functools.partial(_spectral_mul_kernel, unroll=unroll)
    return pl.pallas_call(
        kernel,
        out_shape=out_shape,
        grid=grid,
        in_specs=[x_spec, x_spec, w_spec, w_spec],
        out_specs=(o_spec, o_spec),
        compiler_params=pltpu.CompilerParams(
            dimension_semantics=("parallel", "parallel"),
            vmem_limit_bytes=min(int(vmem_cap * 0.75), 128 * 1024 * 1024),
        ),
    )(x_r, x_i, w_r, w_i)


# ---------------------------------------------------------------------------
# Forward pass matching the PyTorch SpectralConv3d module.
# ---------------------------------------------------------------------------
@functools.partial(jax.jit, static_argnums=(5, 6, 7))
def spectral_conv3d(x, w1, w2, w3, w4, modes1, modes2, modes3):
    """x: (B, Cin, X, Y, Z) float32; wK: (Cin, Cout, m1, m2, m3) complex64."""
    B, Cin, X, Y, Z = x.shape
    Cout = w1.shape[1]
    m1, m2, m3 = modes1, modes2, modes3
    Zr = Z // 2 + 1
    M = m1 * m2 * m3
    Mtot = 4 * M

    # FFT (XLA glue, no Pallas equivalent).
    x_ft = jnp.fft.rfftn(x, axes=(-3, -2, -1))  # (B, Cin, X, Y, Zr) complex64

    # Gather the four retained-mode corners, fold them into the mode axis.
    c1 = x_ft[:, :, :m1, :m2, :m3]
    c2 = x_ft[:, :, -m1:, :m2, :m3]
    c3 = x_ft[:, :, :m1, -m2:, :m3]
    c4 = x_ft[:, :, -m1:, -m2:, :m3]
    xc = jnp.stack([c1, c2, c3, c4], axis=2).reshape(B, Cin, Mtot)
    wc = jnp.stack([w1, w2, w3, w4], axis=2).reshape(Cin, Cout, Mtot)

    # Channel-leading layout: transpose the complex array once, then split.
    xc_t = jnp.transpose(xc, (1, 0, 2))                 # (Cin, B, Mtot)
    x_r = jnp.real(xc_t).astype(jnp.float32)
    x_i = jnp.imag(xc_t).astype(jnp.float32)
    w_r = jnp.real(wc).astype(jnp.float32)
    w_i = jnp.imag(wc).astype(jnp.float32)

    # Zero-pad the lane (mode) axis to a multiple of 128 -> unmasked vld/vst.
    Mpad = ((Mtot + 127) // 128) * 128
    if Mpad != Mtot:
        pad = [(0, 0), (0, 0), (0, Mpad - Mtot)]
        x_r = jnp.pad(x_r, pad)
        x_i = jnp.pad(x_i, pad)
        w_r = jnp.pad(w_r, pad)
        w_i = jnp.pad(w_i, pad)

    out_r, out_i = _spectral_mul(x_r, x_i, w_r, w_i, B, Cin, Cout, Mpad)

    out_c = (out_r[:, :, :Mtot] + 1j * out_i[:, :, :Mtot]).astype(jnp.complex64)
    out_c = out_c.reshape(B, Cout, 4, m1, m2, m3)

    # Scatter the corners into the full (zero-initialized) spectrum.
    # TODO(synk): at small mode counts this XLA glue (zeros + scatter + FFTs)
    # dominates end-to-end time; fusing it needs pl.ANY + manual DMA.
    out_ft = jnp.zeros((B, Cout, X, Y, Zr), dtype=jnp.complex64)
    out_ft = out_ft.at[:, :, :m1, :m2, :m3].set(out_c[:, :, 0])
    out_ft = out_ft.at[:, :, -m1:, :m2, :m3].set(out_c[:, :, 1])
    out_ft = out_ft.at[:, :, :m1, -m2:, :m3].set(out_c[:, :, 2])
    out_ft = out_ft.at[:, :, -m1:, -m2:, :m3].set(out_c[:, :, 3])

    # Inverse FFT (XLA glue).
    return jnp.fft.irfftn(out_ft, s=(X, Y, Z), axes=(-3, -2, -1)).astype(
        jnp.float32)


def _reference(x, w1, w2, w3, w4, m1, m2, m3):
    """Pure-JAX reference (mirrors the PyTorch forward) for validation."""
    B, Cin, X, Y, Z = x.shape
    Cout = w1.shape[1]
    x_ft = jnp.fft.rfftn(x, axes=(-3, -2, -1))
    mul = lambda a, w: jnp.einsum('bixyz,ioxyz->boxyz', a, w)
    out_ft = jnp.zeros((B, Cout, X, Y, Z // 2 + 1), dtype=jnp.complex64)
    out_ft = out_ft.at[:, :, :m1, :m2, :m3].set(
        mul(x_ft[:, :, :m1, :m2, :m3], w1))
    out_ft = out_ft.at[:, :, -m1:, :m2, :m3].set(
        mul(x_ft[:, :, -m1:, :m2, :m3], w2))
    out_ft = out_ft.at[:, :, :m1, -m2:, :m3].set(
        mul(x_ft[:, :, :m1, -m2:, :m3], w3))
    out_ft = out_ft.at[:, :, -m1:, -m2:, :m3].set(
        mul(x_ft[:, :, -m1:, -m2:, :m3], w4))
    return jnp.fft.irfftn(out_ft, s=(X, Y, Z), axes=(-3, -2, -1))


if __name__ == "__main__":
    # Small shapes consistent with the module.
    B, Cin, Cout = 2, 4, 4
    X = Y = Z = 16
    m1 = m2 = m3 = 4

    key = jax.random.PRNGKey(0)
    kx, kw = jax.random.split(key)
    x = jax.random.normal(kx, (B, Cin, X, Y, Z), dtype=jnp.float32)

    # Parameter init mirroring: scale * rand(..., dtype=cfloat)
    scale = 1.0 / (Cin * Cout)
    wkeys = jax.random.split(kw, 8)

    def make_w(kr, ki):
        wr = jax.random.uniform(kr, (Cin, Cout, m1, m2, m3), dtype=jnp.float32)
        wi = jax.random.uniform(ki, (Cin, Cout, m1, m2, m3), dtype=jnp.float32)
        return (scale * (wr + 1j * wi)).astype(jnp.complex64)

    w1 = make_w(wkeys[0], wkeys[1])
    w2 = make_w(wkeys[2], wkeys[3])
    w3 = make_w(wkeys[4], wkeys[5])
    w4 = make_w(wkeys[6], wkeys[7])

    out = spectral_conv3d(x, w1, w2, w3, w4, m1, m2, m3)
    out = jax.block_until_ready(out)

    ref = jax.block_until_ready(_reference(x, w1, w2, w3, w4, m1, m2, m3))
    np.testing.assert_allclose(np.asarray(out), np.asarray(ref),
                               atol=1e-4, rtol=1e-4)

    print("KERNEL_OK")
</pallas_src>

<mosaic_0001>
module attributes {stable_mosaic.version = 11 : i64} {
  func.func @_spectral_mul_kernel(%arg0: i32, %arg1: i32, %arg2: memref<4x2x128xf32, #tpu.memory_space<vmem>>, %arg3: memref<4x2x128xf32, #tpu.memory_space<vmem>>, %arg4: memref<4x4x128xf32, #tpu.memory_space<vmem>>, %arg5: memref<4x4x128xf32, #tpu.memory_space<vmem>>, %arg6: memref<2x4x128xf32, #tpu.memory_space<vmem>>, %arg7: memref<2x4x128xf32, #tpu.memory_space<vmem>>) attributes {dimension_semantics = [#tpu.dimension_semantics<parallel>, #tpu.dimension_semantics<parallel>], iteration_bounds = array<i64: 2, 1>, scalar_prefetch = 0 : i64, scratch_operands = 0 : i64, tpu.core_type = #tpu.core_type<tc>, window_params = [{transform_indices = @transform_0, window_bounds = array<i64: 4, 2, 128>}, {transform_indices = @transform_1, window_bounds = array<i64: 4, 2, 128>}, {transform_indices = @transform_2, window_bounds = array<i64: 4, 4, 128>}, {transform_indices = @transform_3, window_bounds = array<i64: 4, 4, 128>}, {transform_indices = @transform_4, window_bounds = array<i64: 2, 4, 128>}, {transform_indices = @transform_5, window_bounds = array<i64: 2, 4, 128>}]} {
    %cst = arith.constant 0.000000e+00 : f32
    %0 = vector.broadcast %cst : f32 to vector<2x4x128xf32>
    %cst_0 = arith.constant 0.000000e+00 : f32
    %1 = vector.broadcast %cst_0 : f32 to vector<2x4x128xf32>
    %c0 = arith.constant 0 : index
    %c0_1 = arith.constant 0 : index
    %c0_2 = arith.constant 0 : index
    %2 = vector.load %arg2[%c0, %c0_1, %c0_2] : memref<4x2x128xf32, #tpu.memory_space<vmem>>, vector<1x2x128xf32>
    %3 = vector.shape_cast %2 : vector<1x2x128xf32> to vector<2x128xf32>
    %4 = vector.shape_cast %3 : vector<2x128xf32> to vector<2x1x128xf32>
    %c0_3 = arith.constant 0 : index
    %c0_4 = arith.constant 0 : index
    %c0_5 = arith.constant 0 : index
    %5 = vector.load %arg3[%c0_3, %c0_4, %c0_5] : memref<4x2x128xf32, #tpu.memory_space<vmem>>, vector<1x2x128xf32>
    %6 = vector.shape_cast %5 : vector<1x2x128xf32> to vector<2x128xf32>
    %7 = vector.shape_cast %6 : vector<2x128xf32> to vector<2x1x128xf32>
    %c0_6 = arith.constant 0 : index
    %c0_7 = arith.constant 0 : index
    %c0_8 = arith.constant 0 : index
    %8 = vector.load %arg4[%c0_6, %c0_7, %c0_8] : memref<4x4x128xf32, #tpu.memory_space<vmem>>, vector<1x4x128xf32>
    %9 = vector.shape_cast %8 : vector<1x4x128xf32> to vector<4x128xf32>
    %10 = vector.shape_cast %9 : vector<4x128xf32> to vector<1x4x128xf32>
    %c0_9 = arith.constant 0 : index
    %c0_10 = arith.constant 0 : index
    %c0_11 = arith.constant 0 : index
    %11 = vector.load %arg5[%c0_9, %c0_10, %c0_11] : memref<4x4x128xf32, #tpu.memory_space<vmem>>, vector<1x4x128xf32>
    %12 = vector.shape_cast %11 : vector<1x4x128xf32> to vector<4x128xf32>
    %13 = vector.shape_cast %12 : vector<4x128xf32> to vector<1x4x128xf32>
    %14 = vector.broadcast %4 : vector<2x1x128xf32> to vector<2x4x128xf32>
    %15 = vector.broadcast %10 : vector<1x4x128xf32> to vector<2x4x128xf32>
    %16 = arith.mulf %14, %15 : vector<2x4x128xf32>
    %17 = arith.addf %0, %16 : vector<2x4x128xf32>
    %18 = vector.broadcast %7 : vector<2x1x128xf32> to vector<2x4x128xf32>
    %19 = vector.broadcast %13 : vector<1x4x128xf32> to vector<2x4x128xf32>
    %20 = arith.mulf %18, %19 : vector<2x4x128xf32>
    %21 = arith.subf %17, %20 : vector<2x4x128xf32>
    %22 = vector.broadcast %4 : vector<2x1x128xf32> to vector<2x4x128xf32>
    %23 = vector.broadcast %13 : vector<1x4x128xf32> to vector<2x4x128xf32>
    %24 = arith.mulf %22, %23 : vector<2x4x128xf32>
    %25 = arith.addf %1, %24 : vector<2x4x128xf32>
    %26 = vector.broadcast %7 : vector<2x1x128xf32> to vector<2x4x128xf32>
    %27 = vector.broadcast %10 : vector<1x4x128xf32> to vector<2x4x128xf32>
    %28 = arith.mulf %26, %27 : vector<2x4x128xf32>
    %29 = arith.addf %25, %28 : vector<2x4x128xf32>
    %c1 = arith.constant 1 : index
    %c0_12 = arith.constant 0 : index
    %c0_13 = arith.constant 0 : index
    %30 = vector.load %arg2[%c1, %c0_12, %c0_13] : memref<4x2x128xf32, #tpu.memory_space<vmem>>, vector<1x2x128xf32>
    %31 = vector.shape_cast %30 : vector<1x2x128xf32> to vector<2x128xf32>
    %32 = vector.shape_cast %31 : vector<2x128xf32> to vector<2x1x128xf32>
    %c1_14 = arith.constant 1 : index
    %c0_15 = arith.constant 0 : index
    %c0_16 = arith.constant 0 : index
    %33 = vector.load %arg3[%c1_14, %c0_15, %c0_16] : memref<4x2x128xf32, #tpu.memory_space<vmem>>, vector<1x2x128xf32>
    %34 = vector.shape_cast %33 : vector<1x2x128xf32> to vector<2x128xf32>
    %35 = vector.shape_cast %34 : vector<2x128xf32> to vector<2x1x128xf32>
    %c1_17 = arith.constant 1 : index
    %c0_18 = arith.constant 0 : index
    %c0_19 = arith.constant 0 : index
    %36 = vector.load %arg4[%c1_17, %c0_18, %c0_19] : memref<4x4x128xf32, #tpu.memory_space<vmem>>, vector<1x4x128xf32>
    %37 = vector.shape_cast %36 : vector<1x4x128xf32> to vector<4x128xf32>
    %38 = vector.shape_cast %37 : vector<4x128xf32> to vector<1x4x128xf32>
    %c1_20 = arith.constant 1 : index
    %c0_21 = arith.constant 0 : index
    %c0_22 = arith.constant 0 : index
    %39 = vector.load %arg5[%c1_20, %c0_21, %c0_22] : memref<4x4x128xf32, #tpu.memory_space<vmem>>, vector<1x4x128xf32>
    %40 = vector.shape_cast %39 : vector<1x4x128xf32> to vector<4x128xf32>
    %41 = vector.shape_cast %40 : vector<4x128xf32> to vector<1x4x128xf32>
    %42 = vector.broadcast %32 : vector<2x1x128xf32> to vector<2x4x128xf32>
    %43 = vector.broadcast %38 : vector<1x4x128xf32> to vector<2x4x128xf32>
    %44 = arith.mulf %42, %43 : vector<2x4x128xf32>
    %45 = arith.addf %21, %44 : vector<2x4x128xf32>
    %46 = vector.broadcast %35 : vector<2x1x128xf32> to vector<2x4x128xf32>
    %47 = vector.broadcast %41 : vector<1x4x128xf32> to vector<2x4x128xf32>
    %48 = arith.mulf %46, %47 : vector<2x4x128xf32>
    %49 = arith.subf %45, %48 : vector<2x4x128xf32>
    %50 = vector.broadcast %32 : vector<2x1x128xf32> to vector<2x4x128xf32>
    %51 = vector.broadcast %41 : vector<1x4x128xf32> to vector<2x4x128xf32>
    %52 = arith.mulf %50, %51 : vector<2x4x128xf32>
    %53 = arith.addf %29, %52 : vector<2x4x128xf32>
    %54 = vector.broadcast %35 : vector<2x1x128xf32> to vector<2x4x128xf32>
    %55 = vector.broadcast %38 : vector<1x4x128xf32> to vector<2x4x128xf32>
    %56 = arith.mulf %54, %55 : vector<2x4x128xf32>
    %57 = arith.addf %53, %56 : vector<2x4x128xf32>
    %c2 = arith.constant 2 : index
    %c0_23 = arith.constant 0 : index
    %c0_24 = arith.constant 0 : index
    %58 = vector.load %arg2[%c2, %c0_23, %c0_24] : memref<4x2x128xf32, #tpu.memory_space<vmem>>, vector<1x2x128xf32>
    %59 = vector.shape_cast %58 : vector<1x2x128xf32> to vector<2x128xf32>
    %60 = vector.shape_cast %59 : vector<2x128xf32> to vector<2x1x128xf32>
    %c2_25 = arith.constant 2 : index
    %c0_26 = arith.constant 0 : index
    %c0_27 = arith.constant 0 : index
    %61 = vector.load %arg3[%c2_25, %c0_26, %c0_27] : memref<4x2x128xf32, #tpu.memory_space<vmem>>, vector<1x2x128xf32>
    %62 = vector.shape_cast %61 : vector<1x2x128xf32> to vector<2x128xf32>
    %63 = vector.shape_cast %62 : vector<2x128xf32> to vector<2x1x128xf32>
    %c2_28 = arith.constant 2 : index
    %c0_29 = arith.constant 0 : index
    %c0_30 = arith.constant 0 : index
    %64 = vector.load %arg4[%c2_28, %c0_29, %c0_30] : memref<4x4x128xf32, #tpu.memory_space<vmem>>, vector<1x4x128xf32>
    %65 = vector.shape_cast %64 : vector<1x4x128xf32> to vector<4x128xf32>
    %66 = vector.shape_cast %65 : vector<4x128xf32> to vector<1x4x128xf32>
    %c2_31 = arith.constant 2 : index
    %c0_32 = arith.constant 0 : index
    %c0_33 = arith.constant 0 : index
    %67 = vector.load %arg5[%c2_31, %c0_32, %c0_33] : memref<4x4x128xf32, #tpu.memory_space<vmem>>, vector<1x4x128xf32>
    %68 = vector.shape_cast %67 : vector<1x4x128xf32> to vector<4x128xf32>
    %69 = vector.shape_cast %68 : vector<4x128xf32> to vector<1x4x128xf32>
    %70 = vector.broadcast %60 : vector<2x1x128xf32> to vector<2x4x128xf32>
    %71 = vector.broadcast %66 : vector<1x4x128xf32> to vector<2x4x128xf32>
    %72 = arith.mulf %70, %71 : vector<2x4x128xf32>
    %73 = arith.addf %49, %72 : vector<2x4x128xf32>
    %74 = vector.broadcast %63 : vector<2x1x128xf32> to vector<2x4x128xf32>
    %75 = vector.broadcast %69 : vector<1x4x128xf32> to vector<2x4x128xf32>
    %76 = arith.mulf %74, %75 : vector<2x4x128xf32>
    %77 = arith.subf %73, %76 : vector<2x4x128xf32>
    %78 = vector.broadcast %60 : vector<2x1x128xf32> to vector<2x4x128xf32>
    %79 = vector.broadcast %69 : vector<1x4x128xf32> to vector<2x4x128xf32>
    %80 = arith.mulf %78, %79 : vector<2x4x128xf32>
    %81 = arith.addf %57, %80 : vector<2x4x128xf32>
    %82 = vector.broadcast %63 : vector<2x1x128xf32> to vector<2x4x128xf32>
    %83 = vector.broadcast %66 : vector<1x4x128xf32> to vector<2x4x128xf32>
    %84 = arith.mulf %82, %83 : vector<2x4x128xf32>
    %85 = arith.addf %81, %84 : vector<2x4x128xf32>
    %c3 = arith.constant 3 : index
    %c0_34 = arith.constant 0 : index
    %c0_35 = arith.constant 0 : index
    %86 = vector.load %arg2[%c3, %c0_34, %c0_35] : memref<4x2x128xf32, #tpu.memory_space<vmem>>, vector<1x2x128xf32>
    %87 = vector.shape_cast %86 : vector<1x2x128xf32> to vector<2x128xf32>
    %88 = vector.shape_cast %87 : vector<2x128xf32> to vector<2x1x128xf32>
    %c3_36 = arith.constant 3 : index
    %c0_37 = arith.constant 0 : index
    %c0_38 = arith.constant 0 : index
    %89 = vector.load %arg3[%c3_36, %c0_37, %c0_38] : memref<4x2x128xf32, #tpu.memory_space<vmem>>, vector<1x2x128xf32>
    %90 = vector.shape_cast %89 : vector<1x2x128xf32> to vector<2x128xf32>
    %91 = vector.shape_cast %90 : vector<2x128xf32> to vector<2x1x128xf32>
    %c3_39 = arith.constant 3 : index
    %c0_40 = arith.constant 0 : index
    %c0_41 = arith.constant 0 : index
    %92 = vector.load %arg4[%c3_39, %c0_40, %c0_41] : memref<4x4x128xf32, #tpu.memory_space<vmem>>, vector<1x4x128xf32>
    %93 = vector.shape_cast %92 : vector<1x4x128xf32> to vector<4x128xf32>
    %94 = vector.shape_cast %93 : vector<4x128xf32> to vector<1x4x128xf32>
    %c3_42 = arith.constant 3 : index
    %c0_43 = arith.constant 0 : index
    %c0_44 = arith.constant 0 : index
    %95 = vector.load %arg5[%c3_42, %c0_43, %c0_44] : memref<4x4x128xf32, #tpu.memory_space<vmem>>, vector<1x4x128xf32>
    %96 = vector.shape_cast %95 : vector<1x4x128xf32> to vector<4x128xf32>
    %97 = vector.shape_cast %96 : vector<4x128xf32> to vector<1x4x128xf32>
    %98 = vector.broadcast %88 : vector<2x1x128xf32> to vector<2x4x128xf32>
    %99 = vector.broadcast %94 : vector<1x4x128xf32> to vector<2x4x128xf32>
    %100 = arith.mulf %98, %99 : vector<2x4x128xf32>
    %101 = arith.addf %77, %100 : vector<2x4x128xf32>
    %102 = vector.broadcast %91 : vector<2x1x128xf32> to vector<2x4x128xf32>
    %103 = vector.broadcast %97 : vector<1x4x128xf32> to vector<2x4x128xf32>
    %104 = arith.mulf %102, %103 : vector<2x4x128xf32>
    %105 = arith.subf %101, %104 : vector<2x4x128xf32>
    %106 = vector.broadcast %88 : vector<2x1x128xf32> to vector<2x4x128xf32>
    %107 = vector.broadcast %97 : vector<1x4x128xf32> to vector<2x4x128xf32>
    %108 = arith.mulf %106, %107 : vector<2x4x128xf32>
    %109 = arith.addf %85, %108 : vector<2x4x128xf32>
    %110 = vector.broadcast %91 : vector<2x1x128xf32> to vector<2x4x128xf32>
    %111 = vector.broadcast %94 : vector<1x4x128xf32> to vector<2x4x128xf32>
    %112 = arith.mulf %110, %111 : vector<2x4x128xf32>
    %113 = arith.addf %109, %112 : vector<2x4x128xf32>
    %c0_45 = arith.constant 0 : index
    %c0_46 = arith.constant 0 : index
    %c0_47 = arith.constant 0 : index
    %114 = vector.load %arg6[%c0_45, %c0_46, %c0_47] : memref<2x4x128xf32, #tpu.memory_space<vmem>>, vector<2x4x128xf32>
    tpu.vector_store %arg6[%c0_45, %c0_46, %c0_47], %105 {strides = array<i32>} : memref<2x4x128xf32, #tpu.memory_space<vmem>>, vector<2x4x128xf32>,
    %c0_48 = arith.constant 0 : index
    %c0_49 = arith.constant 0 : index
    %c0_50 = arith.constant 0 : index
    %115 = vector.load %arg7[%c0_48, %c0_49, %c0_50] : memref<2x4x128xf32, #tpu.memory_space<vmem>>, vector<2x4x128xf32>
    tpu.vector_store %arg7[%c0_48, %c0_49, %c0_50], %113 {strides = array<i32>} : memref<2x4x128xf32, #tpu.memory_space<vmem>>, vector<2x4x128xf32>,
    return
  }
  func.func @transform_0(%arg0: i32, %arg1: i32) -> (i32, i32, i32) {
    %c0_i32 = arith.constant 0 : i32
    %c0_i32_0 = arith.constant 0 : i32
    %c0_i32_1 = arith.constant 0 : i32
    return %c0_i32, %c0_i32_0, %arg0 : i32, i32, i32
  }
  func.func @transform_1(%arg0: i32, %arg1: i32) -> (i32, i32, i32) {
    %c0_i32 = arith.constant 0 : i32
    %c0_i32_0 = arith.constant 0 : i32
    %c0_i32_1 = arith.constant 0 : i32
    return %c0_i32, %c0_i32_0, %arg0 : i32, i32, i32
  }
  func.func @transform_2(%arg0: i32, %arg1: i32) -> (i32, i32, i32) {
    %c0_i32 = arith.constant 0 : i32
    %c0_i32_0 = arith.constant 0 : i32
    return %c0_i32, %arg1, %arg0 : i32, i32, i32
  }
  func.func @transform_3(%arg0: i32, %arg1: i32) -> (i32, i32, i32) {
    %c0_i32 = arith.constant 0 : i32
    %c0_i32_0 = arith.constant 0 : i32
    return %c0_i32, %arg1, %arg0 : i32, i32, i32
  }
  func.func @transform_4(%arg0: i32, %arg1: i32) -> (i32, i32, i32) {
    %c0_i32 = arith.constant 0 : i32
    %c0_i32_0 = arith.constant 0 : i32
    return %c0_i32, %arg1, %arg0 : i32, i32, i32
  }
  func.func @transform_5(%arg0: i32, %arg1: i32) -> (i32, i32, i32) {
    %c0_i32 = arith.constant 0 : i32
    %c0_i32_0 = arith.constant 0 : i32
    return %c0_i32, %arg1, %arg0 : i32, i32, i32
  }
}

</mosaic_0001>

<bundles_post_ra>
// kernel: custom-call
= control target key start
LH: loop header
LB: loop body
LE: loop exit
PB: predicated region body
PF: predicated region fallthrough
CT: control target
= control target key end

     0   :  { %2 = vsyncpa [#allocation0], 0  ;;  %s61_s0 = inlined_call_operand.hbm [shape: c64[4,4,4,4,4], index: 0, kind: input, shape index: {}]   ;;  %s62_s1 = inlined_call_operand.vmem [shape: f32[4,4,4,4,4], index: 1, kind: output, shape index: {}]  }
   0x1   :  { %s3_s8 = sshll.u32 %s62_s1, 4  ;;  %s9_s11 = scalar_lea.hbm %s61_s0, 4096  ;;  %s4_s8 = int_to_ptr.vmem [resolvable:$true] %s3_s8 }
   0x2   :  { %p10_p0 = scmp.ne.s32.totalorder %s61_s0, %s9_s11  ;;  %s11_s16 = scalar_lea.hbm %s61_s0, 8192 }
   0x3   :  { %p12_p1 = scmp.lt.u32.totalorder %s11_s16, %s9_s11  ;;  %p13_p2 = scmp.lt.u32.totalorder %s9_s11, %s61_s0 }
   0x5   :  { %p14_p3 = por %p13_p2, %p12_p1 }
   0x7   :  { %p15_p4 = pnand %p14_p3, %p10_p0 }
   0x9   :  { %18 = shalt.err (!%p15_p4)  }
   0xa   :  { %s19_s1 = scalar_lea.vmem %s4_s8, 4096  ;;  %p24_p6 = scmp.lt.s32.totalorder %s4_s8, %s4_s8 }
   0xb   :  { %p20_p5 = scmp.ne.s32.totalorder %s4_s8, %s19_s1  ;;  %p25_p7 = scmp.lt.s32.totalorder %s19_s1, %s19_s1 }
   0xd   :  { %p26_p8 = por %p25_p7, %p24_p6 }
   0xf   :  { %p27_p9 = pnand %p26_p8, %p20_p5 }
  0x11   :  { %30 = shalt.err (!%p27_p9)  }
  0x12   :  { %6 = dma.hbm_to_vmem [thread:$0]  %s61_s0, 4096, %s4_s8, [#allocation0] }
  0x13   :  { %31 = dma.done.wait [#allocation0], 4096  }
  0x14   :  { %32 = vsyncadd [#allocation0], 4294963200 }
  0x15   :  { %8 = vsyncpa [#allocation0], 1 }

// kernel: custom-call.1
= control target key start
LH: loop header
LB: loop body
LE: loop exit
PB: predicated region body
PF: predicated region fallthrough
CT: control target
= control target key end

     0   :  { %s59_s0 = inlined_call_operand.hbm [shape: c64[4,4,4,4,4], index: 0, kind: input, shape index: {}]   ;;  %s60_s1 = inlined_call_operand.vmem [shape: f32[4,4,4,4,4], index: 1, kind: output, shape index: {}]  }
   0x1   :  { %s2_s8 = scalar_lea.hbm %s59_s0, 4096 }
   0x2   :  { %3 = vsyncpa [#allocation0], 0  ;;  %s4_s11 = sshll.u32 %s60_s1, 4  ;;  %s34_s14 = scalar_lea.hbm %s59_s0, 8192  ;;  %s5_s11 = int_to_ptr.vmem [resolvable:$true] %s4_s11 }
   0x3   :  { %p11_p0 = scmp.ne.s32.totalorder %s2_s8, %s34_s14  ;;  %p13_p1 = scmp.lt.u32.totalorder %s2_s8, %s59_s0 }
   0x4   :  { %p14_p2 = scmp.lt.u32.totalorder %s34_s14, %s34_s14  ;;  %p16_p4 = scmp.lt.u32.totalorder %s34_s14, %s2_s8 }
   0x6   :  { %p15_p3 = por %p14_p2, %p13_p1 }
   0x8   :  { %p17_p5 = por %p16_p4, %p15_p3 }
   0xa   :  { %p18_p6 = pnand %p17_p5, %p11_p0 }
   0xc   :  { %21 = shalt.err (!%p18_p6)  }
   0xd   :  { %s22_s17 = scalar_lea.vmem %s5_s11, 4096  ;;  %p27_p8 = scmp.lt.s32.totalorder %s5_s11, %s5_s11 }
   0xe   :  { %p23_p7 = scmp.ne.s32.totalorder %s5_s11, %s22_s17  ;;  %p28_p9 = scmp.lt.s32.totalorder %s22_s17, %s22_s17 }
  0x10   :  { %p29_p10 = por %p28_p9, %p27_p8 }
  0x12   :  { %p30_p11 = pnand %p29_p10, %p23_p7 }
  0x14   :  { %33 = shalt.err (!%p30_p11)  }
  0x15   :  { %7 = dma.hbm_to_vmem [thread:$0]  %s2_s8, 4096, %s5_s11, [#allocation0] }
  0x16   :  { %35 = dma.done.wait [#allocation0], 4096  }
  0x17   :  { %36 = vsyncadd [#allocation0], 4294963200 }
  0x18   :  { %9 = vsyncpa [#allocation0], 1 }

// kernel: spectral_conv3d.1
= control target key start
LH: loop header
LB: loop body
LE: loop exit
PB: predicated region body
PF: predicated region fallthrough
CT: control target
= control target key end

     0   :  { %s1302_s18 = smov 0   ;;  %s1304_s19 = smov 0   ;;  %s1521_s0 = inlined_call_operand.vmem [shape: f32[4,2,256], index: 0, kind: input, shape index: {}]   ;;  %s1522_s1 = inlined_call_operand.vmem [shape: f32[4,2,256], index: 1, kind: input, shape index: {}]   ;;  %s1523_s2 = inlined_call_operand.vmem [shape: f32[4,4,256], index: 2, kind: input, shape index: {}]   ;;  %s1524_s3 = inlined_call_operand.vmem [shape: f32[4,4,256], index: 3, kind: input, shape index: {}]   ;;  %s1525_s4 = inlined_call_operand.vmem [shape: f32[2,4,256], index: 4, kind: output, shape index: {0}]   ;;  %s1526_s5 = inlined_call_operand.vmem [shape: f32[2,4,256], index: 5, kind: output, shape index: {1}]  }
   0x1   :  { %s1306_s20 = smov 0   ;;  %s1308_s21 = smov 0  }
   0x2   :  { %s1310_s22 = smov 0  }
   0x3 LB: > { %s28_s23 = sadd.s32 1, %s1265_s21  ;;  %s1145_s24 = sadd.s32 4294967295, %s1269_s22   ;;  %s1269_s22 = sphi %s1310_s22, %s16_s22   ;;  %s1265_s21 = sphi %s1308_s21, %s1532_s21   ;;  %s1261_s20 = sphi %s1306_s20, %s1531_s20   ;;  %s1257_s19 = sphi %s1304_s19, %s1530_s19   ;;  %s1253_s18 = sphi %s1302_s18, %s1529_s18  }
   0x4   : > { %p30_p0 = scmp.ge.s32.totalorder %s28_s23, 2  ;;  %p42_p1 = scmp.ne.s32.totalorder %s1257_s19, %s1253_s18 }
   0x5   : > { %p43_p2 = scmp.eq.s32.totalorder %s1269_s22, 0  ;;  %p156_p4 = scmp.eq.s32.totalorder %s1145_s24, 1 }
   0x6   : > { %s1534_s23 = smov (%p30_p0, %s28_s23), 0  ;;  %s35_s27 = sadd.s32 1, %s1257_s19 }
   0x7   : > { %p1334_p3 = por %p43_p2, %p42_p1  ;;  %s32_s26 = ssub.s32 %s1265_s21, %s1534_s23 }
   0x8   : > { %p33_p5 = scmp.eq.s32.totalorder %s32_s26, 0  ;;  %p1341_p6 = por %p156_p4, %p42_p1 }
   0x9   : > { %p1148_p7 = scmp.ge.s32.totalorder %s1269_s22, 2 }
   0xa   : > { %s1346_s29 = scalar_select %p33_p5, %s1257_s19, %s35_s27  }
   0xb   : > { %206 = sbr.rel (%p1148_p7) target bundleno = 46 (0x2e), region = 16 }
  0x12   : > { %209 = sbr.rel (!%p1334_p3) target bundleno = 25 (0x19), region = 20  ;;  %s211_s30 = sand.u32 (%p1334_p3), 1, %s1257_s19  }
  0x13   : > { %s1150_s6 = sshll.u32 (%p1334_p3), %s1265_s21, 1  ;;  %s1149_s7 = sshll.u32 (%p1334_p3), %s211_s30, 3 }
  0x14   : > { %s215_s10 = scalar_lea.vmem (%p1334_p3), %s1521_s0, %s1150_s6  ;;  %s213_s11 = scalar_lea.vmem (%p1334_p3), [#allocation2], %s1149_s7 }
  0x15   : > { %v231_v0 = vld [vmem:[%s215_s10] sm:$0x3] (%p1334_p3)  ;;  %v233_v1 = vld [vmem:[%s215_s10 + $0x4] sm:$0x3] (%p1334_p3)  ;;  %v235_v2 = vld [vmem:[%s215_s10 + $0x8] sm:$0x3] (%p1334_p3) }
  0x16   : > { %232 = vst [vmem:[%s213_s11] sm:$0x3] (%p1334_p3), %v231_v0  ;;  %234 = vst [vmem:[%s213_s11 + $0x2] sm:$0x3] (%p1334_p3), %v233_v1  ;;  %v237_v3 = vld [vmem:[%s215_s10 + $0xc] sm:$0x3] (%p1334_p3) }
  0x17   : > { %236 = vst [vmem:[%s213_s11 + $0x4] sm:$0x3] (%p1334_p3), %v235_v2  ;;  %238 = vst [vmem:[%s213_s11 + $0x6] sm:$0x3] (%p1334_p3), %v237_v3 }
  0x19 PF: > { %269 = sbr.rel (!%p1334_p3) target bundleno = 32 (0x20), region = 61  ;;  %s271_s12 = sand.u32 (%p1334_p3), 1, %s1257_s19  }
  0x1a   : > { %s1152_s13 = sshll.u32 (%p1334_p3), %s1265_s21, 1  ;;  %s1151_s14 = sshll.u32 (%p1334_p3), %s271_s12, 3 }
  0x1b   : > { %s275_s17 = scalar_lea.vmem (%p1334_p3), %s1522_s1, %s1152_s13  ;;  %s273_s24 = scalar_lea.vmem (%p1334_p3), [#allocation3], %s1151_s14 }
  0x1c   : > { %v291_v4 = vld [vmem:[%s275_s17] sm:$0x3] (%p1334_p3)  ;;  %v293_v5 = vld [vmem:[%s275_s17 + $0x4] sm:$0x3] (%p1334_p3)  ;;  %v295_v6 = vld [vmem:[%s275_s17 + $0x8] sm:$0x3] (%p1334_p3) }
  0x1d   : > { %292 = vst [vmem:[%s273_s24] sm:$0x3] (%p1334_p3), %v291_v4  ;;  %294 = vst [vmem:[%s273_s24 + $0x2] sm:$0x3] (%p1334_p3), %v293_v5  ;;  %v297_v7 = vld [vmem:[%s275_s17 + $0xc] sm:$0x3] (%p1334_p3) }
  0x1e   : > { %296 = vst [vmem:[%s273_s24 + $0x4] sm:$0x3] (%p1334_p3), %v295_v6  ;;  %298 = vst [vmem:[%s273_s24 + $0x6] sm:$0x3] (%p1334_p3), %v297_v7 }
  0x20 PF: > { %329 = sbr.rel (!%p1334_p3) target bundleno = 39 (0x27), region = 102  ;;  %s331_s26 = sand.u32 (%p1334_p3), 1, %s1257_s19  }
  0x21   : > { %s1154_s27 = sshll.u32 (%p1334_p3), %s1265_s21, 2  ;;  %s1153_s30 = sshll.u32 (%p1334_p3), %s331_s26, 4 }
  0x22   : > { %s337_s8 = scalar_lea.vmem (%p1334_p3), %s1523_s2, %s1154_s27  ;;  %s333_s9 = scalar_lea.vmem (%p1334_p3), [#allocation4], %s1153_s30 }
  0x23   : > { %v353_v8 = vld [vmem:[%s337_s8] sm:$0xf] (%p1334_p3)  ;;  %v355_v9 = vld [vmem:[%s337_s8 + $0x8] sm:$0xf] (%p1334_p3)  ;;  %v357_v10 = vld [vmem:[%s337_s8 + $0x10] sm:$0xf] (%p1334_p3) }
  0x24   : > { %354 = vst [vmem:[%s333_s9] sm:$0xf] (%p1334_p3), %v353_v8  ;;  %356 = vst [vmem:[%s333_s9 + $0x4] sm:$0xf] (%p1334_p3), %v355_v9  ;;  %v359_v11 = vld [vmem:[%s337_s8 + $0x18] sm:$0xf] (%p1334_p3) }
  0x25   : > { %358 = vst [vmem:[%s333_s9 + $0x8] sm:$0xf] (%p1334_p3), %v357_v10  ;;  %360 = vst [vmem:[%s333_s9 + $0xc] sm:$0xf] (%p1334_p3), %v359_v11 }
  0x27 PF: > { %391 = sbr.rel (!%p1334_p3) target bundleno = 46 (0x2e), region = 143  ;;  %s393_s10 = sand.u32 (%p1334_p3), 1, %s1257_s19  }
  0x28   : > { %s1156_s11 = sshll.u32 (%p1334_p3), %s1265_s21, 2  ;;  %s1155_s12 = sshll.u32 (%p1334_p3), %s393_s10, 4 }
  0x29   : > { %s399_s15 = scalar_lea.vmem (%p1334_p3), %s1524_s3, %s1156_s11  ;;  %s395_s16 = scalar_lea.vmem (%p1334_p3), [#allocation5], %s1155_s12 }
  0x2a   : > { %v415_v12 = vld [vmem:[%s399_s15] sm:$0xf] (%p1334_p3)  ;;  %v417_v13 = vld [vmem:[%s399_s15 + $0x8] sm:$0xf] (%p1334_p3)  ;;  %v419_v14 = vld [vmem:[%s399_s15 + $0x10] sm:$0xf] (%p1334_p3) }
  0x2b   : > { %416 = vst [vmem:[%s395_s16] sm:$0xf] (%p1334_p3), %v415_v12  ;;  %418 = vst [vmem:[%s395_s16 + $0x4] sm:$0xf] (%p1334_p3), %v417_v13  ;;  %v421_v15 = vld [vmem:[%s399_s15 + $0x18] sm:$0xf] (%p1334_p3) }
  0x2c   : > { %420 = vst [vmem:[%s395_s16 + $0x8] sm:$0xf] (%p1334_p3), %v419_v14  ;;  %422 = vst [vmem:[%s395_s16 + $0xc] sm:$0xf] (%p1334_p3), %v421_v15 }
  0x2e PF: > { %p1157_p8 = scmp.ge.s32.totalorder %s1269_s22, 1  ;;  %p452_p9 = scmp.lt.s32.totalorder %s1269_s22, 3 }
  0x30   : > { %p453_p10 = pnand %p1157_p8, %p452_p9 }
  0x31   : > { %s459_s25 = sand.u32 (!%p453_p10), 1, %s1253_s18   ;;  %v535_v16 = vlaneseq (!%p453_p10)  ;;  %v1271_v17 = vmov (!%p453_p10), 1966171168  }
  0x32   : > { %456 = sbr.rel (%p453_p10) target bundleno = 99 (0x63), region = 184  ;;  %s1380_s17 = sshll.u32 (!%p453_p10), %s459_s25, 3  ;;  %v533_v18 = vunpack.c.l.s4 (!%p453_p10), %v1271_v17 }
  0x33   : > { %s1160_s24 = sshll.u32 (!%p453_p10), %s459_s25, 4  ;;  %v536_v19 = vshrl.u32 (!%p453_p10), %v535_v16, 7  ;;  %s1383_s26 = scalar_lea.vmem (!%p453_p10), [#allocation2], %s1380_s17 }
  0x34   : > { %v1164_v20 = vld.sshfl [vmem:[%s1383_s26] sm:$0x11 pattern:$0x75316420] (!%p453_p10)  ;;  %v534_v21 = vunpack.c.0.s8 (!%p453_p10), %v533_v18  ;;  %s1387_s27 = scalar_lea.vmem (!%p453_p10), [#allocation3], %s1380_s17  ;;  %s1399_s18 = scalar_lea.vmem (!%p453_p10), [#allocation4], %s1160_s24 }
  0x35   : > { %v531_v22 = vcombine.high (!%p453_p10), %v1164_v20, %v1164_v20  ;;  %v1165_v23 = vld.sshfl [vmem:[%s1387_s27] sm:$0x11 pattern:$0x75316420] (!%p453_p10)  ;;  %v1392_v26 = vsub.s32 (!%p453_p10), 0, %v536_v19  ;;  %s1405_s30 = scalar_lea.vmem (!%p453_p10), [#allocation5], %s1160_s24 }
  0x36   : > { %v1390_v24 = vsub.s32 (!%p453_p10), %v534_v21, %v536_v19  ;;  %v555_v25 = vcombine.high (!%p453_p10), %v1165_v23, %v1165_v23  ;;  %v1167_v27 = vld.sshfl [vmem:[%s1383_s26 + $0x2] sm:$0x11 pattern:$0x75316420] (!%p453_p10)  ;;  %v1416_v42 = vld [vmem:[%s1399_s18 + $0x4] sm:$0xf] (!%p453_p10) }
  0x37   : > { %v1402_v32 = vld [vmem:[%s1399_s18] sm:$0xf] (!%p453_p10)  ;;  %v1169_v33 = vld.sshfl [vmem:[%s1387_s27 + $0x2] sm:$0x11 pattern:$0x75316420] (!%p453_p10)  ;;  %v618_v35 = vcombine.high (!%p453_p10), %v1167_v27, %v1167_v27 }
  0x38   : > { %v538_v28 = vrot.slane (!%p453_p10), %v1164_v20, %v1390_v24  ;;  %v545_v29 = vrot.slane (!%p453_p10), %v531_v22, %v1390_v24  ;;  %v562_v30 = vrot.slane (!%p453_p10), %v1165_v23, %v1390_v24  ;;  %v569_v31 = vrot.slane (!%p453_p10), %v555_v25, %v1390_v24  ;;  %v1408_v34 = vld [vmem:[%s1405_s30] sm:$0xf] (!%p453_p10)  ;;  %v1173_v39 = vld.sshfl [vmem:[%s1383_s26 + $0x4] sm:$0x11 pattern:$0x75316420] (!%p453_p10) }
  0x39   : > { %v625_v36 = vrot.slane %v1167_v27, %v1390_v24  ;;  %v643_v37 = vcombine.high %v1169_v33, %v1169_v33  ;;  %v650_v38 = vrot.slane %v1169_v33, %v1390_v24  ;;  %v708_v43 = vcombine.high %v1173_v39, %v1173_v39  ;;  %v1175_v45 = vld.sshfl [vmem:[%s1387_s27 + $0x4] sm:$0x11 pattern:$0x75316420]  ;;  %v1425_v50 = vld [vmem:[%s1399_s18 + $0x8] sm:$0xf] }
  0x3a   : > { %v575_v40 = vrot.slane %v538_v28, %v1392_v26  ;;  %v589_v41 = vrot.slane %v562_v30, %v1392_v26  ;;  %v715_v44 = vrot.slane %v1173_v39, %v1390_v24  ;;  %v632_v46 = vrot.slane %v618_v35, %v1390_v24  ;;  %v1179_v51 = vld.sshfl [vmem:[%s1383_s26 + $0x6] sm:$0x11 pattern:$0x75316420]  ;;  %v1441_v62 = vld [vmem:[%s1399_s18 + $0xc] sm:$0xf] }
  0x3b   : > { %v665_v47 = vrot.slane %v625_v36, %v1392_v26  ;;  %v679_v48 = vrot.slane %v650_v38, %v1392_v26  ;;  %v740_v49 = vrot.slane %v1175_v45, %v1390_v24  ;;  %v1431_v54 = vld [vmem:[%s1405_s30 + $0x4] sm:$0xf]  ;;  %v805_v56 = vrot.slane %v1179_v51, %v1390_v24  ;;  %v1181_v57 = vld.sshfl [vmem:[%s1387_s27 + $0x6] sm:$0x11 pattern:$0x75316420] }
  0x3c   : > { %v582_v52 = vmul.f32 %v575_v40, %v1402_v32  ;;  %v596_v53 = vmul.f32 %v589_v41, %v1408_v34  ;;  %v755_v55 = vrot.slane %v715_v44, %v1392_v26  ;;  %v830_v61 = vrot.slane %v1181_v57, %v1390_v24  ;;  %v1444_v0 = vld [vmem:[%s1405_s30 + $0x8] sm:$0xf]  ;;  %v1454_v9 = vld [vmem:[%s1405_s30 + $0xc] sm:$0xf]  ;;  %s515_s6 = scalar_lea.vmem [#allocation6], %s1380_s17  ;;  %s521_s7 = scalar_lea.vmem [#allocation7], %s1380_s17 }
  0x3d   : > { %v672_v58 = vmul.f32 %v1416_v42, %v665_v47  ;;  %v686_v59 = vmul.f32 %v1431_v54, %v679_v48  ;;  %v769_v60 = vrot.slane %v740_v49, %v1392_v26  ;;  %v845_v2 = vrot.slane %v805_v56, %v1392_v26  ;;  %s1186_s8 = sshll.u32 (%p1341_p6), %s1261_s20, 2 }
  0x3e   : > { %v598_v63 = vsub.f32 %v582_v52, %v596_v53  ;;  %v762_v1 = vmul.f32 %v1425_v50, %v755_v55  ;;  %v579_v3 = vrot.slane %v545_v29, %v1392_v26  ;;  %v859_v5 = vrot.slane %v830_v61, %v1392_v26  ;;  %s896_s11 = scalar_lea.vmem (%p1341_p6), %s1525_s4, %s1186_s8 }
  0x3f   : > { %v776_v4 = vmul.f32 %v1444_v0, %v769_v60  ;;  %v593_v6 = vrot.slane %v569_v31, %v1392_v26  ;;  %v657_v7 = vrot.slane %v643_v37, %v1390_v24  ;;  %v852_v10 = vmul.f32 %v1441_v62, %v845_v2 }
  0x40   : > { %v674_v8 = vadd.f32 %v672_v58, %v598_v63  ;;  %v583_v11 = vmul.f32 %v579_v3, %v1402_v32  ;;  %v669_v12 = vrot.slane %v632_v46, %v1392_v26  ;;  %v866_v13 = vmul.f32 %v1454_v9, %v859_v5 }
  0x41   : > { %v597_v14 = vmul.f32 %v593_v6, %v1408_v34  ;;  %v683_v15 = vrot.slane %v657_v7, %v1392_v26  ;;  %v722_v16 = vrot.slane %v708_v43, %v1390_v24  ;;  %v733_v19 = vcombine.high %v1175_v45, %v1175_v45 }
  0x42   : > { %v688_v17 = vsub.f32 %v674_v8, %v686_v59  ;;  %v673_v18 = vmul.f32 %v1416_v42, %v669_v12  ;;  %v798_v20 = vcombine.high %v1179_v51, %v1179_v51  ;;  %v823_v25 = vcombine.high %v1181_v57, %v1181_v57 }
  0x43   : > { %v599_v21 = vsub.f32 %v583_v11, %v597_v14  ;;  %v687_v22 = vmul.f32 %v1431_v54, %v683_v15  ;;  %v759_v23 = vrot.slane %v722_v16, %v1392_v26  ;;  %v747_v28 = vrot.slane %v733_v19, %v1390_v24 }
  0x44   : > { %v764_v27 = vadd.f32 %v762_v1, %v688_v17  ;;  %v812_v29 = vrot.slane %v798_v20, %v1390_v24  ;;  %v600_v30 = vmul.f32 %v575_v40, %v1408_v34  ;;  %v837_v35 = vrot.slane %v823_v25, %v1390_v24 }
  0x45   : > { %v675_v31 = vadd.f32 %v673_v18, %v599_v21  ;;  %v763_v33 = vmul.f32 %v1425_v50, %v759_v23  ;;  %v604_v36 = vmul.f32 %v589_v41, %v1402_v32  ;;  %v773_v38 = vrot.slane %v747_v28, %v1392_v26 }
  0x46   : > { %v778_v37 = vsub.f32 %v764_v27, %v776_v4  ;;  %v849_v39 = vrot.slane %v812_v29, %v1392_v26  ;;  %v690_v43 = vmul.f32 %v1431_v54, %v665_v47  ;;  %v863_v45 = vrot.slane %v837_v35, %v1392_v26 }
  0x47   : > { %v689_v44 = vsub.f32 %v675_v31, %v687_v22  ;;  %v606_v46 = vadd.f32 %v604_v36, %v600_v30  ;;  %v694_v40 = vmul.f32 %v1416_v42, %v679_v48  ;;  %v777_v51 = vmul.f32 %v1444_v0, %v773_v38 }
  0x48   : > { %v854_v49 = vadd.f32 %v852_v10, %v778_v37  ;;  %v853_v41 = vmul.f32 %v1441_v62, %v849_v39  ;;  %v780_v53 = vmul.f32 %v1444_v0, %v755_v55  ;;  %v867_v57 = vmul.f32 %v1454_v9, %v863_v45 }
  0x49   : > { %v765_v24 = vadd.f32 %v763_v33, %v689_v44  ;;  %v692_v52 = vadd.f32 %v690_v43, %v606_v46  ;;  %v784_v47 = vmul.f32 %v1425_v50, %v769_v60  ;;  %v601_v26 = vmul.f32 %v579_v3, %v1408_v34 }
  0x4a   : > { %v868_v56 = vsub.f32 %v854_v49, %v866_v13  ;;  %v605_v48 = vmul.f32 %v593_v6, %v1402_v32  ;;  %v691_v61 = vmul.f32 %v1431_v54, %v669_v12  ;;  %v870_v63 = vmul.f32 %v1454_v9, %v845_v2 }
  0x4b   : > { %v779_v58 = vsub.f32 %v765_v24, %v777_v51  ;;  %v696_v59 = vadd.f32 %v694_v40, %v692_v52  ;;  %v695_v7 = vmul.f32 %v1416_v42, %v683_v15  ;;  %v874_v60 = vmul.f32 %v1441_v62, %v859_v5 }
  0x4c   : > { %878 = vst [vmem:[%s515_s6] sm:$0xf] %v868_v56  ;;  %v607_v4 = vadd.f32 %v605_v48, %v601_v26  ;;  %v781_v10 = vmul.f32 %v1444_v0, %v759_v23  ;;  %v785_v6 = vmul.f32 %v1425_v50, %v773_v38  ;;  %v871_v12 = vmul.f32 %v1454_v9, %v849_v39 }
  0x4d   : > { %v855_v1 = vadd.f32 %v853_v41, %v779_v58  ;;  %v782_v55 = vadd.f32 %v780_v53, %v696_v59  ;;  %v875_v42 = vmul.f32 %v1441_v62, %v863_v45 }
  0x4e   : > { %v693_v3 = vadd.f32 %v691_v61, %v607_v4 }
  0x4f   : > { %v869_v8 = vsub.f32 %v855_v1, %v867_v57  ;;  %v786_v34 = vadd.f32 %v784_v47, %v782_v55 }
  0x50   : > { %v697_v54 = vadd.f32 %v695_v7, %v693_v3 }
  0x51   : > { %879 = vst [vmem:[%s515_s6 + $0x4] sm:$0xf] %v869_v8  ;;  %v872_v32 = vadd.f32 %v870_v63, %v786_v34 }
  0x52   : > { %v783_v2 = vadd.f32 %v781_v10, %v697_v54 }
  0x53   : > { %v876_v11 = vadd.f32 %v874_v60, %v872_v32  ;;  %v912_v0 = vld [vmem:[%s515_s6] sm:$0xf] (%p1341_p6) }
  0x54   : > { %v787_v13 = vadd.f32 %v785_v6, %v783_v2  ;;  %892 = sbr.rel (!%p1341_p6) target bundleno = 91 (0x5b), region = 204  ;;  %913 = vst [vmem:[%s896_s11] sm:$0xf] (%p1341_p6), %v912_v0 }
  0x55   : > { %880 = vst [vmem:[%s521_s7] sm:$0xf] %v876_v11 }
  0x56   : > { %v873_v5 = vadd.f32 %v871_v12, %v787_v13 }
  0x58   : > { %v877_v14 = vadd.f32 %v875_v42, %v873_v5  ;;  %v914_v15 = vld [vmem:[%s515_s6 + $0x4] sm:$0xf] (%p1341_p6) }
  0x59   : > { %915 = vst [vmem:[%s896_s11 + $0x8] sm:$0xf] (%p1341_p6), %v914_v15 }
  0x5a   : > { %881 = vst [vmem:[%s521_s7 + $0x4] sm:$0xf] %v877_v14 }
  0x5b PF: > { %942 = sbr.rel (!%p1341_p6) target bundleno = 99 (0x63), region = 245  ;;  %s1187_s12 = sshll.u32 (%p1341_p6), %s1261_s20, 2 }
  0x5c   : > { %v962_v50 = vld [vmem:[%s521_s7] sm:$0xf] (%p1341_p6)  ;;  %s946_s15 = scalar_lea.vmem (%p1341_p6), %s1526_s5, %s1187_s12 }
  0x5d   : > { %963 = vst [vmem:[%s946_s15] sm:$0xf] (%p1341_p6), %v962_v50 }
  0x61   : > { %v964_v62 = vld [vmem:[%s521_s7 + $0x4] sm:$0xf] (%p1341_p6) }
  0x62   : > { %965 = vst [vmem:[%s946_s15 + $0x8] sm:$0xf] %v964_v62 }
  0x63 PF: > { %s16_s22 = sadd.s32 1, %s1269_s22   ;;  %s1529_s18 = smov %s1257_s19 }
  0x64   : > { %p13_p11 = scmp.ge.s32.totalorder %s16_s22, 4   ;;  %s1530_s19 = smov %s1346_s29 }
  0x65   : > { %s1531_s20 = smov %s1265_s21  ;;  %s1532_s21 = smov %s1534_s23 }
  0x66   :  { %15 = sbr.rel (!%p13_p11) target bundleno = 3 (0x3), region = 365 }

// kernel: reverse.1
= control target key start
LH: loop header
LB: loop body
LE: loop exit
PB: predicated region body
PF: predicated region fallthrough
CT: control target
= control target key end

     0   :  { %s1352_s0 = inlined_call_operand.vmem [shape: f32[2,4,16,16,7], index: 0, kind: input, shape index: {}]   ;;  %s1353_s1 = inlined_call_operand.vmem [shape: f32[2,4,16,16,7], index: 1, kind: output, shape index: {}]  }
   0x1   :  { %v448_v0 = vld [vmem:[%s1352_s0 + $0x60] sm:$0xff]  ;;  %v451_v2 = vld [vmem:[%s1352_s0 + $0xd0] sm:$0xff]  ;;  %v558_v56 = vld [vmem:[%s1352_s0 + $0x68] sm:$0xff] }
   0x2   :  { %v449_v1 = vld [vmem:[%s1352_s0 + $0x220] sm:$0xff]  ;;  %4 = vst [vmem:[%s1353_s1] sm:$0xff] %v448_v0  ;;  %452 = vst [vmem:[%s1353_s1 + $0x70] sm:$0xff] %v451_v2  ;;  %v453_v3 = vld [vmem:[%s1352_s0 + $0x290] sm:$0xff] }
   0x3   :  { %450 = vst [vmem:[%s1353_s1 + $0x1c0] sm:$0xff] %v449_v1  ;;  %v455_v4 = vld [vmem:[%s1352_s0 + $0x140] sm:$0xff]  ;;  %454 = vst [vmem:[%s1353_s1 + $0x230] sm:$0xff] %v453_v3  ;;  %v459_v6 = vld [vmem:[%s1352_s0 + $0x1b0] sm:$0xff] }
   0x4   :  { %v457_v5 = vld [vmem:[%s1352_s0 + $0x300] sm:$0xff]  ;;  %456 = vst [vmem:[%s1353_s1 + $0xe0] sm:$0xff] %v455_v4  ;;  %v461_v7 = vld [vmem:[%s1352_s0 + $0x370] sm:$0xff]  ;;  %460 = vst [vmem:[%s1353_s1 + $0x150] sm:$0xff] %v459_v6 }
   0x5   :  { %458 = vst [vmem:[%s1353_s1 + $0x2a0] sm:$0xff] %v457_v5  ;;  %v463_v8 = vld [vmem:[%s1352_s0 + $0x50] sm:$0xff]  ;;  %462 = vst [vmem:[%s1353_s1 + $0x310] sm:$0xff] %v461_v7  ;;  %v467_v10 = vld [vmem:[%s1352_s0 + $0xc0] sm:$0xff] }
   0x6   :  { %464 = vst [vmem:[%s1353_s1 + $0x10] sm:$0xff] %v463_v8  ;;  %v465_v9 = vld [vmem:[%s1352_s0 + $0x210] sm:$0xff]  ;;  %v469_v11 = vld [vmem:[%s1352_s0 + $0x280] sm:$0xff]  ;;  %468 = vst [vmem:[%s1353_s1 + $0x80] sm:$0xff] %v467_v10 }
   0x7   :  { %466 = vst [vmem:[%s1353_s1 + $0x1d0] sm:$0xff] %v465_v9  ;;  %470 = vst [vmem:[%s1353_s1 + $0x240] sm:$0xff] %v469_v11  ;;  %v471_v12 = vld [vmem:[%s1352_s0 + $0x130] sm:$0xff]  ;;  %v475_v14 = vld [vmem:[%s1352_s0 + $0x1a0] sm:$0xff] }
   0x8   :  { %v473_v13 = vld [vmem:[%s1352_s0 + $0x2f0] sm:$0xff]  ;;  %472 = vst [vmem:[%s1353_s1 + $0xf0] sm:$0xff] %v471_v12  ;;  %476 = vst [vmem:[%s1353_s1 + $0x160] sm:$0xff] %v475_v14  ;;  %v477_v15 = vld [vmem:[%s1352_s0 + $0x360] sm:$0xff] }
   0x9   :  { %474 = vst [vmem:[%s1353_s1 + $0x2b0] sm:$0xff] %v473_v13  ;;  %v479_v16 = vld [vmem:[%s1352_s0 + $0x40] sm:$0xff]  ;;  %478 = vst [vmem:[%s1353_s1 + $0x320] sm:$0xff] %v477_v15  ;;  %v483_v18 = vld [vmem:[%s1352_s0 + $0xb0] sm:$0xff] }
   0xa   :  { %v481_v17 = vld [vmem:[%s1352_s0 + $0x200] sm:$0xff]  ;;  %480 = vst [vmem:[%s1353_s1 + $0x20] sm:$0xff] %v479_v16  ;;  %v485_v19 = vld [vmem:[%s1352_s0 + $0x270] sm:$0xff]  ;;  %484 = vst [vmem:[%s1353_s1 + $0x90] sm:$0xff] %v483_v18 }
   0xb   :  { %482 = vst [vmem:[%s1353_s1 + $0x1e0] sm:$0xff] %v481_v17  ;;  %v487_v20 = vld [vmem:[%s1352_s0 + $0x120] sm:$0xff]  ;;  %486 = vst [vmem:[%s1353_s1 + $0x250] sm:$0xff] %v485_v19  ;;  %v491_v22 = vld [vmem:[%s1352_s0 + $0x190] sm:$0xff] }
   0xc   :  { %488 = vst [vmem:[%s1353_s1 + $0x100] sm:$0xff] %v487_v20  ;;  %v489_v21 = vld [vmem:[%s1352_s0 + $0x2e0] sm:$0xff]  ;;  %v493_v23 = vld [vmem:[%s1352_s0 + $0x350] sm:$0xff]  ;;  %492 = vst [vmem:[%s1353_s1 + $0x170] sm:$0xff] %v491_v22 }
   0xd   :  { %490 = vst [vmem:[%s1353_s1 + $0x2c0] sm:$0xff] %v489_v21  ;;  %494 = vst [vmem:[%s1353_s1 + $0x330] sm:$0xff] %v493_v23  ;;  %v495_v24 = vld [vmem:[%s1352_s0 + $0x30] sm:$0xff]  ;;  %v499_v26 = vld [vmem:[%s1352_s0 + $0xa0] sm:$0xff] }
   0xe   :  { %v497_v25 = vld [vmem:[%s1352_s0 + $0x1f0] sm:$0xff]  ;;  %496 = vst [vmem:[%s1353_s1 + $0x30] sm:$0xff] %v495_v24  ;;  %500 = vst [vmem:[%s1353_s1 + $0xa0] sm:$0xff] %v499_v26  ;;  %v501_v27 = vld [vmem:[%s1352_s0 + $0x260] sm:$0xff] }
   0xf   :  { %498 = vst [vmem:[%s1353_s1 + $0x1f0] sm:$0xff] %v497_v25  ;;  %v503_v28 = vld [vmem:[%s1352_s0 + $0x110] sm:$0xff]  ;;  %502 = vst [vmem:[%s1353_s1 + $0x260] sm:$0xff] %v501_v27  ;;  %v507_v30 = vld [vmem:[%s1352_s0 + $0x180] sm:$0xff] }
  0x10   :  { %v505_v29 = vld [vmem:[%s1352_s0 + $0x2d0] sm:$0xff]  ;;  %504 = vst [vmem:[%s1353_s1 + $0x110] sm:$0xff] %v503_v28  ;;  %v509_v31 = vld [vmem:[%s1352_s0 + $0x340] sm:$0xff]  ;;  %508 = vst [vmem:[%s1353_s1 + $0x180] sm:$0xff] %v507_v30 }
  0x11   :  { %506 = vst [vmem:[%s1353_s1 + $0x2d0] sm:$0xff] %v505_v29  ;;  %v511_v32 = vld [vmem:[%s1352_s0 + $0x20] sm:$0xff]  ;;  %510 = vst [vmem:[%s1353_s1 + $0x340] sm:$0xff] %v509_v31  ;;  %v515_v34 = vld [vmem:[%s1352_s0 + $0x90] sm:$0xff] }
  0x12   :  { %512 = vst [vmem:[%s1353_s1 + $0x40] sm:$0xff] %v511_v32  ;;  %v513_v33 = vld [vmem:[%s1352_s0 + $0x1e0] sm:$0xff]  ;;  %v517_v35 = vld [vmem:[%s1352_s0 + $0x250] sm:$0xff]  ;;  %516 = vst [vmem:[%s1353_s1 + $0xb0] sm:$0xff] %v515_v34 }
  0x13   :  { %514 = vst [vmem:[%s1353_s1 + $0x200] sm:$0xff] %v513_v33  ;;  %518 = vst [vmem:[%s1353_s1 + $0x270] sm:$0xff] %v517_v35  ;;  %v519_v36 = vld [vmem:[%s1352_s0 + $0x100] sm:$0xff]  ;;  %v523_v38 = vld [vmem:[%s1352_s0 + $0x170] sm:$0xff] }
  0x14   :  { %v521_v37 = vld [vmem:[%s1352_s0 + $0x2c0] sm:$0xff]  ;;  %520 = vst [vmem:[%s1353_s1 + $0x120] sm:$0xff] %v519_v36  ;;  %524 = vst [vmem:[%s1353_s1 + $0x190] sm:$0xff] %v523_v38  ;;  %v525_v39 = vld [vmem:[%s1352_s0 + $0x330] sm:$0xff] }
  0x15   :  { %522 = vst [vmem:[%s1353_s1 + $0x2e0] sm:$0xff] %v521_v37  ;;  %v527_v40 = vld [vmem:[%s1352_s0 + $0x10] sm:$0xff]  ;;  %526 = vst [vmem:[%s1353_s1 + $0x350] sm:$0xff] %v525_v39  ;;  %v531_v42 = vld [vmem:[%s1352_s0 + $0x80] sm:$0xff] }
  0x16   :  { %v529_v41 = vld [vmem:[%s1352_s0 + $0x1d0] sm:$0xff]  ;;  %528 = vst [vmem:[%s1353_s1 + $0x50] sm:$0xff] %v527_v40  ;;  %v533_v43 = vld [vmem:[%s1352_s0 + $0x240] sm:$0xff]  ;;  %532 = vst [vmem:[%s1353_s1 + $0xc0] sm:$0xff] %v531_v42 }
  0x17   :  { %530 = vst [vmem:[%s1353_s1 + $0x210] sm:$0xff] %v529_v41  ;;  %v535_v44 = vld [vmem:[%s1352_s0 + $0xf0] sm:$0xff]  ;;  %534 = vst [vmem:[%s1353_s1 + $0x280] sm:$0xff] %v533_v43  ;;  %v539_v46 = vld [vmem:[%s1352_s0 + $0x160] sm:$0xff] }
  0x18   :  { %536 = vst [vmem:[%s1353_s1 + $0x130] sm:$0xff] %v535_v44  ;;  %v537_v45 = vld [vmem:[%s1352_s0 + $0x2b0] sm:$0xff]  ;;  %v541_v47 = vld [vmem:[%s1352_s0 + $0x320] sm:$0xff]  ;;  %540 = vst [vmem:[%s1353_s1 + $0x1a0] sm:$0xff] %v539_v46 }
  0x19   :  { %538 = vst [vmem:[%s1353_s1 + $0x2f0] sm:$0xff] %v537_v45  ;;  %542 = vst [vmem:[%s1353_s1 + $0x360] sm:$0xff] %v541_v47  ;;  %v193_v48 = vld [vmem:[%s1352_s0] sm:$0xff]  ;;  %v546_v50 = vld [vmem:[%s1352_s0 + $0x70] sm:$0xff] }
  0x1a   :  { %v544_v49 = vld [vmem:[%s1352_s0 + $0x1c0] sm:$0xff]  ;;  %543 = vst [vmem:[%s1353_s1 + $0x60] sm:$0xff] %v193_v48  ;;  %547 = vst [vmem:[%s1353_s1 + $0xd0] sm:$0xff] %v546_v50  ;;  %v548_v51 = vld [vmem:[%s1352_s0 + $0x230] sm:$0xff] }
  0x1b   :  { %545 = vst [vmem:[%s1353_s1 + $0x220] sm:$0xff] %v544_v49  ;;  %v550_v52 = vld [vmem:[%s1352_s0 + $0xe0] sm:$0xff]  ;;  %549 = vst [vmem:[%s1353_s1 + $0x290] sm:$0xff] %v548_v51  ;;  %v554_v54 = vld [vmem:[%s1352_s0 + $0x150] sm:$0xff] }
  0x1c   :  { %v552_v53 = vld [vmem:[%s1352_s0 + $0x2a0] sm:$0xff]  ;;  %551 = vst [vmem:[%s1353_s1 + $0x140] sm:$0xff] %v550_v52  ;;  %v556_v55 = vld [vmem:[%s1352_s0 + $0x310] sm:$0xff]  ;;  %555 = vst [vmem:[%s1353_s1 + $0x1b0] sm:$0xff] %v554_v54 }
  0x1d   :  { %553 = vst [vmem:[%s1353_s1 + $0x300] sm:$0xff] %v552_v53  ;;  %557 = vst [vmem:[%s1353_s1 + $0x370] sm:$0xff] %v556_v55  ;;  %v560_v57 = vld [vmem:[%s1352_s0 + $0x228] sm:$0xff]  ;;  %v562_v58 = vld [vmem:[%s1352_s0 + $0xd8] sm:$0xff] }
  0x1e   :  { %559 = vst [vmem:[%s1353_s1 + $0x8] sm:$0xff] %v558_v56  ;;  %v564_v59 = vld [vmem:[%s1352_s0 + $0x298] sm:$0xff]  ;;  %561 = vst [vmem:[%s1353_s1 + $0x1c8] sm:$0xff] %v560_v57  ;;  %v566_v60 = vld [vmem:[%s1352_s0 + $0x148] sm:$0xff] }
  0x1f   :  { %563 = vst [vmem:[%s1353_s1 + $0x78] sm:$0xff] %v562_v58  ;;  %565 = vst [vmem:[%s1353_s1 + $0x238] sm:$0xff] %v564_v59  ;;  %v568_v61 = vld [vmem:[%s1352_s0 + $0x308] sm:$0xff]  ;;  %v570_v62 = vld [vmem:[%s1352_s0 + $0x1b8] sm:$0xff] }
  0x20   :  { %567 = vst [vmem:[%s1353_s1 + $0xe8] sm:$0xff] %v566_v60  ;;  %569 = vst [vmem:[%s1353_s1 + $0x2a8] sm:$0xff] %v568_v61  ;;  %v572_v63 = vld [vmem:[%s1352_s0 + $0x378] sm:$0xff]  ;;  %v578_v2 = vld [vmem:[%s1352_s0 + $0xc8] sm:$0xff] }
  0x21   :  { %571 = vst [vmem:[%s1353_s1 + $0x158] sm:$0xff] %v570_v62  ;;  %v574_v0 = vld [vmem:[%s1352_s0 + $0x58] sm:$0xff]  ;;  %573 = vst [vmem:[%s1353_s1 + $0x318] sm:$0xff] %v572_v63  ;;  %v580_v3 = vld [vmem:[%s1352_s0 + $0x288] sm:$0xff] }
  0x22   :  { %v576_v1 = vld [vmem:[%s1352_s0 + $0x218] sm:$0xff]  ;;  %575 = vst [vmem:[%s1353_s1 + $0x18] sm:$0xff] %v574_v0  ;;  %579 = vst [vmem:[%s1353_s1 + $0x88] sm:$0xff] %v578_v2  ;;  %v586_v6 = vld [vmem:[%s1352_s0 + $0x1a8] sm:$0xff] }
  0x23   :  { %577 = vst [vmem:[%s1353_s1 + $0x1d8] sm:$0xff] %v576_v1  ;;  %v582_v4 = vld [vmem:[%s1352_s0 + $0x138] sm:$0xff]  ;;  %581 = vst [vmem:[%s1353_s1 + $0x248] sm:$0xff] %v580_v3  ;;  %v588_v7 = vld [vmem:[%s1352_s0 + $0x368] sm:$0xff] }
  0x24   :  { %583 = vst [vmem:[%s1353_s1 + $0xf8] sm:$0xff] %v582_v4  ;;  %v584_v5 = vld [vmem:[%s1352_s0 + $0x2f8] sm:$0xff]  ;;  %587 = vst [vmem:[%s1353_s1 + $0x168] sm:$0xff] %v586_v6  ;;  %v590_v8 = vld [vmem:[%s1352_s0 + $0x48] sm:$0xff] }
  0x25   :  { %585 = vst [vmem:[%s1353_s1 + $0x2b8] sm:$0xff] %v584_v5  ;;  %589 = vst [vmem:[%s1353_s1 + $0x328] sm:$0xff] %v588_v7  ;;  %v592_v9 = vld [vmem:[%s1352_s0 + $0x208] sm:$0xff]  ;;  %v594_v10 = vld [vmem:[%s1352_s0 + $0xb8] sm:$0xff] }
  0x26   :  { %591 = vst [vmem:[%s1353_s1 + $0x28] sm:$0xff] %v590_v8  ;;  %593 = vst [vmem:[%s1353_s1 + $0x1e8] sm:$0xff] %v592_v9  ;;  %v596_v11 = vld [vmem:[%s1352_s0 + $0x278] sm:$0xff]  ;;  %v598_v12 = vld [vmem:[%s1352_s0 + $0x128] sm:$0xff] }
  0x27   :  { %595 = vst [vmem:[%s1353_s1 + $0x98] sm:$0xff] %v594_v10  ;;  %v600_v13 = vld [vmem:[%s1352_s0 + $0x2e8] sm:$0xff]  ;;  %597 = vst [vmem:[%s1353_s1 + $0x258] sm:$0xff] %v596_v11  ;;  %v602_v14 = vld [vmem:[%s1352_s0 + $0x198] sm:$0xff] }
  0x28   :  { %599 = vst [vmem:[%s1353_s1 + $0x108] sm:$0xff] %v598_v12  ;;  %601 = vst [vmem:[%s1353_s1 + $0x2c8] sm:$0xff] %v600_v13  ;;  %v604_v15 = vld [vmem:[%s1352_s0 + $0x358] sm:$0xff]  ;;  %v610_v18 = vld [vmem:[%s1352_s0 + $0xa8] sm:$0xff] }
  0x29   :  { %v606_v16 = vld [vmem:[%s1352_s0 + $0x38] sm:$0xff]  ;;  %603 = vst [vmem:[%s1353_s1 + $0x178] sm:$0xff] %v602_v14  ;;  %605 = vst [vmem:[%s1353_s1 + $0x338] sm:$0xff] %v604_v15  ;;  %v612_v19 = vld [vmem:[%s1352_s0 + $0x268] sm:$0xff] }
  0x2a   :  { %607 = vst [vmem:[%s1353_s1 + $0x38] sm:$0xff] %v606_v16  ;;  %v608_v17 = vld [vmem:[%s1352_s0 + $0x1f8] sm:$0xff]  ;;  %611 = vst [vmem:[%s1353_s1 + $0xa8] sm:$0xff] %v610_v18  ;;  %v618_v22 = vld [vmem:[%s1352_s0 + $0x188] sm:$0xff] }
  0x2b   :  { %609 = vst [vmem:[%s1353_s1 + $0x1f8] sm:$0xff] %v608_v17  ;;  %613 = vst [vmem:[%s1353_s1 + $0x268] sm:$0xff] %v612_v19  ;;  %v614_v20 = vld [vmem:[%s1352_s0 + $0x118] sm:$0xff]  ;;  %v620_v23 = vld [vmem:[%s1352_s0 + $0x348] sm:$0xff] }
  0x2c   :  { %v616_v21 = vld [vmem:[%s1352_s0 + $0x2d8] sm:$0xff]  ;;  %615 = vst [vmem:[%s1353_s1 + $0x118] sm:$0xff] %v614_v20  ;;  %619 = vst [vmem:[%s1353_s1 + $0x188] sm:$0xff] %v618_v22  ;;  %v622_v24 = vld [vmem:[%s1352_s0 + $0x28] sm:$0xff] }
  0x2d   :  { %617 = vst [vmem:[%s1353_s1 + $0x2d8] sm:$0xff] %v616_v21  ;;  %v624_v25 = vld [vmem:[%s1352_s0 + $0x1e8] sm:$0xff]  ;;  %621 = vst [vmem:[%s1353_s1 + $0x348] sm:$0xff] %v620_v23  ;;  %v626_v26 = vld [vmem:[%s1352_s0 + $0x98] sm:$0xff] }
  0x2e   :  { %623 = vst [vmem:[%s1353_s1 + $0x48] sm:$0xff] %v622_v24  ;;  %625 = vst [vmem:[%s1353_s1 + $0x208] sm:$0xff] %v624_v25  ;;  %v628_v27 = vld [vmem:[%s1352_s0 + $0x258] sm:$0xff]  ;;  %v630_v28 = vld [vmem:[%s1352_s0 + $0x108] sm:$0xff] }
  0x2f   :  { %627 = vst [vmem:[%s1353_s1 + $0xb8] sm:$0xff] %v626_v26  ;;  %629 = vst [vmem:[%s1353_s1 + $0x278] sm:$0xff] %v628_v27  ;;  %v632_v29 = vld [vmem:[%s1352_s0 + $0x2c8] sm:$0xff]  ;;  %v634_v30 = vld [vmem:[%s1352_s0 + $0x178] sm:$0xff] }
  0x30   :  { %631 = vst [vmem:[%s1353_s1 + $0x128] sm:$0xff] %v630_v28  ;;  %v636_v31 = vld [vmem:[%s1352_s0 + $0x338] sm:$0xff]  ;;  %633 = vst [vmem:[%s1353_s1 + $0x2e8] sm:$0xff] %v632_v29  ;;  %v642_v34 = vld [vmem:[%s1352_s0 + $0x88] sm:$0xff] }
  0x31   :  { %635 = vst [vmem:[%s1353_s1 + $0x198] sm:$0xff] %v634_v30  ;;  %637 = vst [vmem:[%s1353_s1 + $0x358] sm:$0xff] %v636_v31  ;;  %v638_v32 = vld [vmem:[%s1352_s0 + $0x18] sm:$0xff]  ;;  %v644_v35 = vld [vmem:[%s1352_s0 + $0x248] sm:$0xff] }
  0x32   :  { %v640_v33 = vld [vmem:[%s1352_s0 + $0x1d8] sm:$0xff]  ;;  %639 = vst [vmem:[%s1353_s1 + $0x58] sm:$0xff] %v638_v32  ;;  %643 = vst [vmem:[%s1353_s1 + $0xc8] sm:$0xff] %v642_v34  ;;  %v650_v38 = vld [vmem:[%s1352_s0 + $0x168] sm:$0xff] }
  0x33   :  { %641 = vst [vmem:[%s1353_s1 + $0x218] sm:$0xff] %v640_v33  ;;  %v646_v36 = vld [vmem:[%s1352_s0 + $0xf8] sm:$0xff]  ;;  %645 = vst [vmem:[%s1353_s1 + $0x288] sm:$0xff] %v644_v35  ;;  %v652_v39 = vld [vmem:[%s1352_s0 + $0x328] sm:$0xff] }
  0x34   :  { %v648_v37 = vld [vmem:[%s1352_s0 + $0x2b8] sm:$0xff]  ;;  %647 = vst [vmem:[%s1353_s1 + $0x138] sm:$0xff] %v646_v36  ;;  %v654_v40 = vld [vmem:[%s1352_s0 + $0x8] sm:$0xff]  ;;  %651 = vst [vmem:[%s1353_s1 + $0x1a8] sm:$0xff] %v650_v38 }
  0x35   :  { %649 = vst [vmem:[%s1353_s1 + $0x2f8] sm:$0xff] %v648_v37  ;;  %653 = vst [vmem:[%s1353_s1 + $0x368] sm:$0xff] %v652_v39  ;;  %v656_v41 = vld [vmem:[%s1352_s0 + $0x1c8] sm:$0xff]  ;;  %v658_v42 = vld [vmem:[%s1352_s0 + $0x78] sm:$0xff] }
  0x36   :  { %655 = vst [vmem:[%s1353_s1 + $0x68] sm:$0xff] %v654_v40  ;;  %v660_v43 = vld [vmem:[%s1352_s0 + $0x238] sm:$0xff]  ;;  %657 = vst [vmem:[%s1353_s1 + $0x228] sm:$0xff] %v656_v41  ;;  %v662_v44 = vld [vmem:[%s1352_s0 + $0xe8] sm:$0xff] }
  0x37   :  { %659 = vst [vmem:[%s1353_s1 + $0xd8] sm:$0xff] %v658_v42  ;;  %661 = vst [vmem:[%s1353_s1 + $0x298] sm:$0xff] %v660_v43  ;;  %v664_v45 = vld [vmem:[%s1352_s0 + $0x2a8] sm:$0xff]  ;;  %v666_v46 = vld [vmem:[%s1352_s0 + $0x158] sm:$0xff] }
  0x38   :  { %663 = vst [vmem:[%s1353_s1 + $0x148] sm:$0xff] %v662_v44  ;;  %665 = vst [vmem:[%s1353_s1 + $0x308] sm:$0xff] %v664_v45  ;;  %v668_v47 = vld [vmem:[%s1352_s0 + $0x318] sm:$0xff] }
  0x39   :  { %667 = vst [vmem:[%s1353_s1 + $0x1b8] sm:$0xff] %v666_v46  ;;  %669 = vst [vmem:[%s1353_s1 + $0x378] sm:$0xff] %v668_v47 }

</bundles_post_ra>
